<compile_context>
chip_gen: v7x
topology: tpu7x:2x2x1
jax: 0.10.0
libtpu: 0.0.40
codegen_flags: <defaults>
</compile_context>

<pallas_src>
import functools

import jax
import jax.numpy as jnp
from jax import lax
from jax.experimental import pallas as pl
from jax.experimental.pallas import tpu as pltpu


def _hash_u32(idx_u32, seed_u32):
    """Wang hash on uint32 — shared by kernel and pure-JAX reference."""
    z = idx_u32 ^ seed_u32
    z = (z ^ jnp.uint32(61)) ^ (z >> jnp.uint32(16))
    z = z * jnp.uint32(9)
    z = z ^ (z >> jnp.uint32(4))
    z = z * jnp.uint32(0x27D4EB2D)
    z = z ^ (z >> jnp.uint32(15))
    return z


def _dropout_keep_mask(shape, row_offset, hidden_dim, seed_u32, drop_rate):
    """Boolean keep-mask from global element index (tiling independent)."""
    row = lax.broadcasted_iota(jnp.int32, shape, 0) + row_offset
    col = lax.broadcasted_iota(jnp.int32, shape, 1)
    gidx = (row * hidden_dim + col).astype(jnp.uint32)
    z = _hash_u32(gidx, seed_u32)
    # Integer threshold compare (top 31 bits vs drop_rate * 2^31): one shift +
    # one signed compare instead of shift/convert/fmul/float-compare.
    thresh = jnp.int32(int(drop_rate * float(2 ** 31)))
    return (z >> jnp.uint32(1)).astype(jnp.int32) >= thresh


def _classifier_kernel(seed_ref, x_ref, w1_ref, b1_ref, w2_ref, b2_ref, o_ref,
                       *, drop_rate, apply_dropout, block_m, hidden_dim):
    # x:(bm, in_dim)  w1:(in_dim, in_dim)  b1:(1, in_dim)
    # w2:(in_dim, out_pad)  b2:(1, out_pad)  o:(bm, out_pad)
    x = x_ref[...]
    h = jnp.dot(x, w1_ref[...], preferred_element_type=jnp.float32) + b1_ref[...]
    h = jnp.maximum(h, 0.0)                                   # ReLU

    if apply_dropout:
        keep = _dropout_keep_mask(
            h.shape,
            row_offset=pl.program_id(0) * block_m,
            hidden_dim=hidden_dim,
            seed_u32=seed_ref[0].astype(jnp.uint32),
            drop_rate=drop_rate,
        )
        h = jnp.where(keep, h * (1.0 / (1.0 - drop_rate)), 0.0)

    o_ref[...] = (jnp.dot(h, w2_ref[...], preferred_element_type=jnp.float32)
                  + b2_ref[...]).astype(o_ref.dtype)


def classifier_forward(x, params, seed, *, drop_rate=0.3, training=True,
                       block_m=None):
    """x: (B, in_dim) f32. params = (w1, b1, w2, b2), weights pre-transposed."""
    w1, b1, w2, b2 = params
    B, in_dim = x.shape
    out_dim = w2.shape[1]

    # Lane-dense output: pad out_dim up to a multiple of 128 so the final HBM
    # store is unmasked (a last dim of 8 would lower to masked vst.msk).
    out_pad = ((out_dim + 127) // 128) * 128
    if out_pad != out_dim:
        w2p = jnp.pad(w2, ((0, 0), (0, out_pad - out_dim)))
        b2p = jnp.pad(b2, ((0, 0), (0, out_pad - out_dim)))
    else:
        w2p, b2p = w2, b2

    # Batch tiling: single grid point for small batches (avoids per-step
    # pipeline overhead entirely), 256-row tiles otherwise.
    if block_m is None:
        block_m = B if B <= 256 else 256
    grid_m = pl.cdiv(B, block_m)
    B_pad = grid_m * block_m
    xp = jnp.pad(x, ((0, B_pad - B), (0, 0))) if B_pad != B else x

    kernel = functools.partial(
        _classifier_kernel,
        drop_rate=float(drop_rate),
        apply_dropout=bool(training) and drop_rate > 0.0,
        block_m=block_m,
        hidden_dim=in_dim,
    )

    # TODO(synk): for production in_dim (2k-4k) add a K/N reduction grid axis
    # + f32 accumulator scratch and an explicit vmem_limit_bytes so the
    # weight-resident BlockSpecs also fit v7x's 64 MiB VMEM.
    out = pl.pallas_call(
        kernel,
        out_shape=jax.ShapeDtypeStruct((B_pad, out_pad), jnp.float32),
        grid_spec=pltpu.PrefetchScalarGridSpec(
            num_scalar_prefetch=1,                       # seed -> SMEM
            grid=(grid_m,),
            in_specs=[
                pl.BlockSpec((block_m, in_dim), lambda i, seed: (i, 0)),   # x tile
                pl.BlockSpec((in_dim, in_dim), lambda i, seed: (0, 0)),    # w1
                pl.BlockSpec((1, in_dim), lambda i, seed: (0, 0)),         # b1
                pl.BlockSpec((in_dim, out_pad), lambda i, seed: (0, 0)),   # w2 (padded)
                pl.BlockSpec((1, out_pad), lambda i, seed: (0, 0)),        # b2 (padded)
            ],
            out_specs=pl.BlockSpec((block_m, out_pad), lambda i, seed: (i, 0)),
        ),
        compiler_params=pltpu.CompilerParams(
            dimension_semantics=("parallel",)),          # batch tiles independent
    )(seed, xp, w1, b1, w2p, b2p)

    return out[:B, :out_dim]


def reference_forward(x, params, seed, drop_rate, training):
    """Pure-JAX reference with the exact same hash-based dropout mask."""
    w1, b1, w2, b2 = params
    h = jnp.maximum(jnp.dot(x, w1, precision=lax.Precision.HIGHEST) + b1, 0.0)
    if training and drop_rate > 0.0:
        keep = _dropout_keep_mask(
            h.shape, row_offset=0, hidden_dim=h.shape[1],
            seed_u32=seed[0].astype(jnp.uint32), drop_rate=float(drop_rate))
        h = jnp.where(keep, h / (1.0 - drop_rate), 0.0)
    return jnp.dot(h, w2, precision=lax.Precision.HIGHEST) + b2


if __name__ == "__main__":
    # Small shapes consistent with the module: batch=16, in_dim=32, out_dim=8.
    B, in_dim, out_dim = 16, 32, 8
    key = jax.random.PRNGKey(0)
    k_x, k_w1, k_b1, k_w2, k_b2 = jax.random.split(key, 5)

    x = jax.random.normal(k_x, (B, in_dim), jnp.float32)
    w1 = jax.random.normal(k_w1, (in_dim, in_dim), jnp.float32) * 0.1
    b1 = jax.random.normal(k_b1, (1, in_dim), jnp.float32) * 0.1
    w2 = jax.random.normal(k_w2, (in_dim, out_dim), jnp.float32) * 0.1
    b2 = jax.random.normal(k_b2, (1, out_dim), jnp.float32) * 0.1
    seed = jnp.array([1234], dtype=jnp.int32)
    params = (w1, b1, w2, b2)

    # Training mode (dropout active, matches F.dropout default training=True).
    out_train = classifier_forward(x, params, seed, drop_rate=0.3, training=True)
    jax.block_until_ready(out_train)
    assert out_train.shape == (B, out_dim)
    ref_train = reference_forward(x, params, seed, 0.3, True)
    assert jnp.allclose(out_train, ref_train, atol=5e-3, rtol=5e-3), \
        float(jnp.max(jnp.abs(out_train - ref_train)))

    # Eval mode (dropout disabled) vs. pure-JAX reference.
    out_eval = classifier_forward(x, params, seed, drop_rate=0.3, training=False)
    ref_eval = reference_forward(x, params, seed, 0.3, False)
    assert jnp.allclose(out_eval, ref_eval, atol=5e-3, rtol=5e-3), \
        float(jnp.max(jnp.abs(out_eval - ref_eval)))

    print("KERNEL_OK")
</pallas_src>

<mosaic_0001>
module attributes {stable_mosaic.version = 11 : i64} {
  func.func @_classifier_kernel(%arg0: i32, %arg1: memref<1xi32, #tpu.memory_space<smem>>, %arg2: memref<16x32xf32, #tpu.memory_space<vmem>>, %arg3: memref<32x32xf32, #tpu.memory_space<vmem>>, %arg4: memref<1x32xf32, #tpu.memory_space<vmem>>, %arg5: memref<32x128xf32, #tpu.memory_space<vmem>>, %arg6: memref<1x128xf32, #tpu.memory_space<vmem>>, %arg7: memref<16x128xf32, #tpu.memory_space<vmem>>) attributes {dimension_semantics = [#tpu.dimension_semantics<parallel>], iteration_bounds = array<i64: 1>, scalar_prefetch = 1 : i64, scratch_operands = 0 : i64, tpu.core_type = #tpu.core_type<tc>, window_params = [{transform_indices = @transform_0, window_bounds = array<i64: 16, 32>}, {pipeline_mode = #tpu.pipeline_mode<synchronous>, transform_indices = @transform_1, window_bounds = array<i64: 32, 32>}, {pipeline_mode = #tpu.pipeline_mode<synchronous>, transform_indices = @transform_2, window_bounds = array<i64: 1, 32>}, {pipeline_mode = #tpu.pipeline_mode<synchronous>, transform_indices = @transform_3, window_bounds = array<i64: 32, 128>}, {pipeline_mode = #tpu.pipeline_mode<synchronous>, transform_indices = @transform_4, window_bounds = array<i64: 1, 128>}, {transform_indices = @transform_5, window_bounds = array<i64: 16, 128>}]} {
    %c0 = arith.constant 0 : index
    %c0_0 = arith.constant 0 : index
    %0 = vector.load %arg2[%c0, %c0_0] : memref<16x32xf32, #tpu.memory_space<vmem>>, vector<16x32xf32>
    %c0_1 = arith.constant 0 : index
    %c0_2 = arith.constant 0 : index
    %1 = vector.load %arg3[%c0_1, %c0_2] : memref<32x32xf32, #tpu.memory_space<vmem>>, vector<32x32xf32>
    %cst = arith.constant dense<0.000000e+00> : vector<16x32xf32>
    %2 = tpu.matmul %0, %1, %cst {dimension_numbers = #tpu.dot_dimension_numbers<[1], [0], [0], [1], [0, 0, 1, 1], [], []>} : vector<16x32xf32>, vector<32x32xf32>, vector<16x32xf32> -> vector<16x32xf32>
    %c0_3 = arith.constant 0 : index
    %c0_4 = arith.constant 0 : index
    %3 = vector.load %arg4[%c0_3, %c0_4] : memref<1x32xf32, #tpu.memory_space<vmem>>, vector<1x32xf32>
    %4 = vector.broadcast %3 : vector<1x32xf32> to vector<16x32xf32>
    %5 = arith.addf %2, %4 : vector<16x32xf32>
    %cst_5 = arith.constant 0.000000e+00 : f32
    %6 = vector.broadcast %cst_5 : f32 to vector<16x32xf32>
    %7 = arith.maximumf %5, %6 : vector<16x32xf32>
    %c16_i32 = arith.constant 16 : i32
    %8 = arith.muli %arg0, %c16_i32 : i32
    %c0_6 = arith.constant 0 : index
    %9 = memref.load %arg1[%c0_6] : memref<1xi32, #tpu.memory_space<smem>>
    %10 = tpu.iota {dimensions = array<i32: 0>} : vector<16x32xi32>
    %11 = vector.broadcast %8 : i32 to vector<16x32xi32>
    %12 = arith.addi %10, %11 : vector<16x32xi32>
    %13 = tpu.iota {dimensions = array<i32: 1>} : vector<16x32xi32>
    %c32_i32 = arith.constant 32 : i32
    %14 = vector.broadcast %c32_i32 : i32 to vector<16x32xi32>
    %15 = arith.muli %12, %14 : vector<16x32xi32>
    %16 = arith.addi %15, %13 : vector<16x32xi32>
    %17 = vector.broadcast %9 : i32 to vector<16x32xi32>
    %18 = arith.xori %16, %17 : vector<16x32xi32>
    %c61_i32 = arith.constant 61 : i32
    %19 = vector.broadcast %c61_i32 : i32 to vector<16x32xi32>
    %20 = arith.xori %18, %19 : vector<16x32xi32>
    %c16_i32_7 = arith.constant 16 : i32
    %21 = vector.broadcast %c16_i32_7 : i32 to vector<16x32xi32>
    %22 = arith.shrui %18, %21 : vector<16x32xi32>
    %23 = arith.xori %20, %22 : vector<16x32xi32>
    %c9_i32 = arith.constant 9 : i32
    %24 = vector.broadcast %c9_i32 : i32 to vector<16x32xi32>
    %25 = arith.muli %23, %24 : vector<16x32xi32>
    %c4_i32 = arith.constant 4 : i32
    %26 = vector.broadcast %c4_i32 : i32 to vector<16x32xi32>
    %27 = arith.shrui %25, %26 : vector<16x32xi32>
    %28 = arith.xori %25, %27 : vector<16x32xi32>
    %c668265261_i32 = arith.constant 668265261 : i32
    %29 = vector.broadcast %c668265261_i32 : i32 to vector<16x32xi32>
    %30 = arith.muli %28, %29 : vector<16x32xi32>
    %c15_i32 = arith.constant 15 : i32
    %31 = vector.broadcast %c15_i32 : i32 to vector<16x32xi32>
    %32 = arith.shrui %30, %31 : vector<16x32xi32>
    %33 = arith.xori %30, %32 : vector<16x32xi32>
    %c1_i32 = arith.constant 1 : i32
    %34 = vector.broadcast %c1_i32 : i32 to vector<16x32xi32>
    %35 = arith.shrui %33, %34 : vector<16x32xi32>
    %c644245094_i32 = arith.constant 644245094 : i32
    %36 = vector.broadcast %c644245094_i32 : i32 to vector<16x32xi32>
    %37 = arith.cmpi sge, %35, %36 : vector<16x32xi32>
    %cst_8 = arith.constant 1.42857146 : f32
    %38 = vector.broadcast %cst_8 : f32 to vector<16x32xf32>
    %39 = arith.mulf %7, %38 : vector<16x32xf32>
    %cst_9 = arith.constant 0.000000e+00 : f32
    %40 = vector.broadcast %cst_9 : f32 to vector<16x32xf32>
    %41 = arith.select %37, %39, %40 : vector<16x32xi1>, vector<16x32xf32>
    %c0_10 = arith.constant 0 : index
    %c0_11 = arith.constant 0 : index
    %42 = vector.load %arg5[%c0_10, %c0_11] : memref<32x128xf32, #tpu.memory_space<vmem>>, vector<32x128xf32>
    %cst_12 = arith.constant dense<0.000000e+00> : vector<16x128xf32>
    %43 = tpu.matmul %41, %42, %cst_12 {dimension_numbers = #tpu.dot_dimension_numbers<[1], [0], [0], [1], [0, 0, 1, 1], [], []>} : vector<16x32xf32>, vector<32x128xf32>, vector<16x128xf32> -> vector<16x128xf32>
    %c0_13 = arith.constant 0 : index
    %c0_14 = arith.constant 0 : index
    %44 = vector.load %arg6[%c0_13, %c0_14] : memref<1x128xf32, #tpu.memory_space<vmem>>, vector<1x128xf32>
    %45 = vector.broadcast %44 : vector<1x128xf32> to vector<16x128xf32>
    %46 = arith.addf %43, %45 : vector<16x128xf32>
    %c0_15 = arith.constant 0 : index
    %c0_16 = arith.constant 0 : index
    %47 = vector.load %arg7[%c0_15, %c0_16] : memref<16x128xf32, #tpu.memory_space<vmem>>, vector<16x128xf32>
    tpu.vector_store %arg7[%c0_15, %c0_16], %46 {strides = array<i32>} : memref<16x128xf32, #tpu.memory_space<vmem>>, vector<16x128xf32>,
    return
  }
  func.func @transform_0(%arg0: i32, %arg1: memref<1xi32, #tpu.memory_space<smem>>) -> (i32, i32) {
    %c0_i32 = arith.constant 0 : i32
    %c0_i32_0 = arith.constant 0 : i32
    return %arg0, %c0_i32 : i32, i32
  }
  func.func @transform_1(%arg0: i32, %arg1: memref<1xi32, #tpu.memory_space<smem>>) -> (i32, i32) {
    %c0_i32 = arith.constant 0 : i32
    %c0_i32_0 = arith.constant 0 : i32
    %c0_i32_1 = arith.constant 0 : i32
    return %c0_i32, %c0_i32_0 : i32, i32
  }
  func.func @transform_2(%arg0: i32, %arg1: memref<1xi32, #tpu.memory_space<smem>>) -> (i32, i32) {
    %c0_i32 = arith.constant 0 : i32
    %c0_i32_0 = arith.constant 0 : i32
    %c0_i32_1 = arith.constant 0 : i32
    return %c0_i32, %c0_i32_0 : i32, i32
  }
  func.func @transform_3(%arg0: i32, %arg1: memref<1xi32, #tpu.memory_space<smem>>) -> (i32, i32) {
    %c0_i32 = arith.constant 0 : i32
    %c0_i32_0 = arith.constant 0 : i32
    %c0_i32_1 = arith.constant 0 : i32
    return %c0_i32, %c0_i32_0 : i32, i32
  }
  func.func @transform_4(%arg0: i32, %arg1: memref<1xi32, #tpu.memory_space<smem>>) -> (i32, i32) {
    %c0_i32 = arith.constant 0 : i32
    %c0_i32_0 = arith.constant 0 : i32
    %c0_i32_1 = arith.constant 0 : i32
    return %c0_i32, %c0_i32_0 : i32, i32
  }
  func.func @transform_5(%arg0: i32, %arg1: memref<1xi32, #tpu.memory_space<smem>>) -> (i32, i32) {
    %c0_i32 = arith.constant 0 : i32
    %c0_i32_0 = arith.constant 0 : i32
    return %arg0, %c0_i32 : i32, i32
  }
}

</mosaic_0001>

<bundles_post_ra>
// kernel: tpu_custom_call.1
= control target key start
LH: loop header
LB: loop body
LE: loop exit
PB: predicated region body
PF: predicated region fallthrough
CT: control target
= control target key end

     0   :  { %12 = vsyncpa [#allocation5], 0  ;;  %s593_s0 = inlined_call_operand.<no memory space> [shape: s32[1], index: 0, kind: input, shape index: {}]   ;;  %s594_s1 = inlined_call_operand.hbm [shape: f32[16,32], index: 1, kind: input, shape index: {}]   ;;  %s595_s2 = inlined_call_operand.hbm [shape: f32[32,32], index: 2, kind: input, shape index: {}]   ;;  %s596_s3 = inlined_call_operand.vmem [shape: f32[1,32], index: 3, kind: input, shape index: {}]   ;;  %s597_s4 = inlined_call_operand.hbm [shape: f32[32,128], index: 4, kind: input, shape index: {}]   ;;  %s598_s5 = inlined_call_operand.vmem [shape: f32[1,128], index: 5, kind: input, shape index: {}]   ;;  %s599_s6 = inlined_call_operand.hbm [shape: f32[16,128], index: 6, kind: output, shape index: {}]  }
   0x1   :  { %13 = vsyncpa [#allocation8], 0 }
   0x2   :  { %14 = vsyncpa [#allocation6], 0  ;;  %s472_s21 = smov [#allocation7]   ;;  %s473_s23 = smov [#allocation4]  }
   0x3   :  { %s32_s22 = sshll.u32 %s472_s21, 4  ;;  %s20_s24 = sshll.u32 %s473_s23, 4  ;;  %s33_s22 = int_to_ptr.vmem [resolvable:$true] %s32_s22  ;;  %s513_s24 = int_to_ptr.vmem [resolvable:$true] %s20_s24 }
   0x4   :  { %s378_s27 = scalar_lea.hbm %s595_s2, 512 }
   0x5   :  { %p379_p0 = scmp.ne.s32.totalorder %s595_s2, %s378_s27  ;;  %p382_p1 = scmp.lt.u32.totalorder %s378_s27, %s595_s2 }
   0x7   :  { %p384_p2 = pnand %p382_p1, %p379_p0 }
   0x9   :  { %387 = shalt.err (!%p384_p2)
}
   0xa   :  { %s388_s8 = scalar_lea.vmem %s33_s22, 512  ;;  %p393_p4 = scmp.lt.s32.totalorder %s33_s22, %s33_s22 }
   0xb   :  { %p389_p3 = scmp.ne.s32.totalorder %s33_s22, %s388_s8  ;;  %p394_p5 = scmp.lt.s32.totalorder %s388_s8, %s388_s8 }
   0xd   :  { %p395_p6 = por %p394_p5, %p393_p4 }
   0xf   :  { %p396_p7 = pnand %p395_p6, %p389_p3 }
  0x11   :  { %399 = shalt.err (!%p396_p7)
}
  0x12   :  { %s474_s9 = smov 128   ;;  %s475_s10 = smov 8  }
  0x13   :  { %38 = dma.hbm_to_vmem [thread:$0]  %s595_s2, 512, %s33_s22, [#allocation8], %s474_s9, %s474_s9, %s475_s10  }
  0x14   :  { %s400_s15 = scalar_lea.hbm %s594_s1, 256 }
  0x15   :  { %p401_p8 = scmp.ne.s32.totalorder %s594_s1, %s400_s15  ;;  %p404_p9 = scmp.lt.u32.totalorder %s400_s15, %s594_s1 }
  0x17   :  { %p406_p10 = pnand %p404_p9, %p401_p8 }
  0x19   :  { %409 = shalt.err (!%p406_p10)
}
  0x1a   :  { %s410_s20 = scalar_lea.vmem %s513_s24, 256  ;;  %p415_p12 = scmp.lt.s32.totalorder %s513_s24, %s513_s24 }
  0x1b   :  { %p411_p11 = scmp.ne.s32.totalorder %s513_s24, %s410_s20  ;;  %p416_p13 = scmp.lt.s32.totalorder %s410_s20, %s410_s20 }
  0x1d   :  { %p417_p0 = por %p416_p13, %p415_p12 }
  0x1f   :  { %p418_p1 = pnand %p417_p0, %p411_p11 }
  0x21   :  { %421 = shalt.err (!%p418_p1)
}
  0x22   :  { %26 = dma.hbm_to_vmem [thread:$0]  %s594_s1, 256, %s513_s24, [#allocation5], %s474_s9, %s474_s9, %s475_s10  }
  0x23   :  { %s476_s22 = smov [#allocation9]   ;;  %s422_s27 = scalar_lea.hbm %s597_s4, 512 }
  0x24   :  { %s46_s23 = sshll.u32 %s476_s22, 4  ;;  %p423_p2 = scmp.ne.s32.totalorder %s597_s4, %s422_s27  ;;  %s47_s23 = int_to_ptr.vmem [resolvable:$true] %s46_s23 }
  0x25   :  { %p426_p3 = scmp.lt.u32.totalorder %s422_s27, %s597_s4 }
  0x27   :  { %p428_p4 = pnand %p426_p3, %p423_p2 }
  0x29   :  { %431 = shalt.err (!%p428_p4)
}
  0x2a   :  { %s432_s8 = scalar_lea.vmem %s47_s23, 512  ;;  %p437_p6 = scmp.lt.s32.totalorder %s47_s23, %s47_s23 }
  0x2b   :  { %p433_p5 = scmp.ne.s32.totalorder %s47_s23, %s432_s8  ;;  %p438_p7 = scmp.lt.s32.totalorder %s432_s8, %s432_s8 }
  0x2d   :  { %p439_p8 = por %p438_p7, %p437_p6 }
  0x2f   :  { %p440_p9 = pnand %p439_p8, %p433_p5 }
  0x31   :  { %443 = shalt.err (!%p440_p9)
}
  0x32   :  { %52 = dma.hbm_to_vmem [thread:$0]  %s597_s4, 512, %s47_s23, [#allocation8], %s474_s9, %s474_s9, %s475_s10  }
  0x33   :  { %466 = dma.done.wait [#allocation5], 256  }
  0x34   :  { %467 = vsyncadd [#allocation5], 4294967040 }
  0x35   :  { %468 = dma.done.wait [#allocation8], 1024  }
  0x36   :  { %469 = vsyncadd [#allocation8], 4294966272  ;;  %vm77_vm0 = vcmask 261120   ;;  %v66_v0 = vld [vmem:[#allocation7] sm:$0xff]  ;;  %v67_v1 = vld [vmem:[#allocation7 + $0x8] sm:$0xff]  ;;  %v163_v14 = vlaneseq  ;;  %v175_v22 = vstv %s593_s0  ;;  %s477_s14 = smov [#allocation10]  }
  0x37   :  { %v68_v2 = vld [vmem:[#allocation7 + $0x10] sm:$0xff]  ;;  %v356_v3 = vpack.c.bf16 %v67_v1, %v66_v0  ;;  %v69_v4 = vld [vmem:[#allocation7 + $0x18] sm:$0xff]  ;;  %v204_v8 = vld [vmem:[#allocation9] sm:$0xff]  ;;  %s303_s15 = sshll.u32 %s477_s14, 4  ;;  %s304_s15 = int_to_ptr.vmem [resolvable:$true] %s303_s15 }
  0x38   :  { %v64_v5 = vld [vmem:[#allocation4] sm:$0xff]  ;;  %v360_v6 = vpack.c.bf16 %v69_v4, %v68_v2  ;;  %v65_v7 = vld [vmem:[#allocation4 + $0x8] sm:$0xff]  ;;  %v205_v9 = vld [vmem:[#allocation9 + $0x8] sm:$0xff]  ;;  %v164_v15 = vshrl.u32 %v163_v14, 7  ;;  %v170_v17 = vand.u32 127, %v163_v14  ;;  %s444_s16 = scalar_lea.vmem %s304_s15, 256  ;;  %p449_p11 = scmp.lt.s32.totalorder %s304_s15, %s304_s15 }
  0x39   :  { %342 = vmatprep.mubr.msk.f32.mxu0 %vm77_vm0, %v64_v5  ;;  %357 = vmatprep.subr.bf16.mxu0 %v356_v3  ;;  %v364_v10 = vpack.c.bf16 %v205_v9, %v204_v8  ;;  %v206_v11 = vld [vmem:[#allocation9 + $0x10] sm:$0xff]  ;;  %v207_v12 = vld [vmem:[#allocation9 + $0x18] sm:$0xff]  ;;  %p445_p10 = scmp.ne.s32.totalorder %s304_s15, %s444_s16  ;;  %p450_p12 = scmp.lt.s32.totalorder %s444_s16, %s444_s16 }
  0x3a   :  { %359 = vmatpush3.bf16.msra.mxu0 %v356_v3  ;;  %v368_v13 = vpack.c.bf16 %v207_v12, %v206_v11  ;;  %v165_v16 = vadd.s32 8, %v164_v15  ;;  %v171_v18 = vmul.u32 32, %v164_v15  ;;  %v316_v42 = vld [vmem:[%s596_s3] ss:$0 sm:$0xff] }
  0x3b   :  { %361 = vmatprep.subr.bf16.mxu0 %v360_v6  ;;  %365 = vmatprep.subr.bf16.mxu1 %v364_v10  ;;  %v319_v56 = vld [vmem:[%s598_s5] ss:$0 sm:$0xff]  ;;  %p451_p13 = por %p450_p12, %p449_p11 }
  0x3c   :  { %367 = vmatpush3.bf16.msra.mxu1 %v364_v10  ;;  %v172_v19 = vmul.u32 32, %v165_v16  ;;  %v173_v20 = vadd.s32 %v171_v18, %v170_v17 }
  0x3d   :  { %369 = vmatprep.subr.bf16.mxu1 %v368_v13  ;;  %p452_p0 = pnand %p451_p13, %p445_p10 }
  0x3e   :  { %363 = vmatpush3.bf16.msra.mxu0 %v360_v6  ;;  %v174_v21 = vadd.s32 %v172_v19, %v170_v17  ;;  %v176_v23 = vxor.u32 %v175_v22, %v173_v20 }
  0x40   :  { %371 = vmatpush3.bf16.msra.mxu1 %v368_v13  ;;  %v177_v24 = vxor.u32 %v175_v22, %v174_v21  ;;  %v178_v25 = vxor.u32 61, %v176_v23  ;;  %v180_v26 = vshrl.u32 %v176_v23, 16 }
  0x41   :  { %343 = vmatmul.mubr.msk.f32.vlgmr.msra.gmra.mrb[0].mxu0 %vm77_vm0, %v65_v7 }
  0x42   :  { %v179_v27 = vxor.u32 61, %v177_v24  ;;  %v181_v28 = vshrl.u32 %v177_v24, 16  ;;  %v182_v29 = vxor.u32 %v180_v26, %v178_v25 }
  0x44   :  { %v183_v30 = vxor.u32 %v181_v28, %v179_v27  ;;  %v184_v31 = vmul.u32 9, %v182_v29 }
  0x46   :  { %v185_v32 = vmul.u32 9, %v183_v30  ;;  %v186_v33 = vshrl.u32 %v184_v31, 4 }
  0x48   :  { %v187_v34 = vshrl.u32 %v185_v32, 4  ;;  %v188_v35 = vxor.u32 %v186_v33, %v184_v31 }
  0x4a   :  { %v189_v36 = vxor.u32 %v187_v34, %v185_v32  ;;  %v190_v37 = vmul.u32 668265261, %v188_v35 }
  0x4c   :  { %v191_v38 = vmul.u32 668265261, %v189_v36  ;;  %v192_v39 = vshrl.u32 %v190_v37, 15 }
  0x4e   :  { %v193_v40 = vshrl.u32 %v191_v38, 15  ;;  %v194_v41 = vxor.u32 %v192_v39, %v190_v37 }
  0x50   :  { %v195_v43 = vxor.u32 %v193_v40, %v191_v38  ;;  %v196_v47 = vshrl.u32 %v194_v41, 1 }
  0x52   :  { %v197_v49 = vshrl.u32 %v195_v43, 1  ;;  %vm198_vm1 = vcmp.ge.s32.totalorder %v196_v47, 644245094 }
  0x54   :  { %vm199_vm2 = vcmp.ge.s32.totalorder %v197_v49, 644245094 }
 0x114   :  { %v344_v44 = vpop.f32.mrb[0].mxu0 }
 0x115   :  { %v156_v45 = vadd.f32 %v344_v44, %v316_v42  ;;  %v150_v46 = vpop.f32.mrb[1].mxu0 }
 0x116   :  { %v151_v48 = vadd.f32 %v316_v42, %v150_v46 }
 0x117   :  { %v160_v50 = vmax.f32 %v156_v45, 0.0 }
 0x118   :  { %v159_v51 = vmax.f32 %v151_v48, 0.0 }
 0x119   :  { %v201_v52 = vmul.f32 1.4285715, %v160_v50 }
 0x11a   :  { %v200_v53 = vmul.f32 1.4285715, %v159_v51 }
 0x11b   :  { %v203_v55 = vsel %vm199_vm2, %v201_v52, 0.0 }
 0x11c   :  { %v202_v54 = vsel %vm198_vm1, %v200_v53, 0.0 }
 0x11d   :  { %353 = vmatprep.mubr.msk.f32.mxu1 %vm77_vm0, %v202_v54 }
 0x11e   :  { %354 = vmatmul.mubr.msk.f32.vlgmr.msra.gmra.mrb[0].mxu1 %vm77_vm0, %v203_v55 }
 0x1f1   :  { %v355_v57 = vpop.f32.mrb[0].mxu1 }
 0x1f2   :  { %v293_v58 = vadd.f32 %v355_v57, %v319_v56  ;;  %v287_v59 = vpop.f32.mrb[1].mxu1 }
 0x1f3   :  { %v288_v60 = vadd.f32 %v319_v56, %v287_v59 }
 0x1f4   :  { %297 = vst [vmem:[#allocation10 + $0x8] sm:$0xff] %v293_v58 }
 0x1f5   :  { %296 = vst [vmem:[#allocation10] sm:$0xff] %v288_v60 }
 0x1f6   :  { %455 = shalt.err (!%p452_p0)
}
 0x1f7   :  { %s456_s5 = scalar_lea.hbm %s599_s6, 256 }
 0x1f8   :  { %p457_p1 = scmp.ne.s32.totalorder %s599_s6, %s456_s5  ;;  %p460_p2 = scmp.lt.u32.totalorder %s456_s5, %s599_s6 }
 0x1fa   :  { %p462_p3 = pnand %p460_p2, %p457_p1 }
 0x1fc   :  { %465 = shalt.err (!%p462_p3)
}
 0x1fd   :  { %309 = dma.vmem_to_hbm [thread:$0]  %s304_s15, 256, %s599_s6, [#allocation6], %s474_s9, %s474_s9, %s475_s10  }
 0x1fe   :  { %470 = dma.done.wait [#allocation6], 256  }
 0x1ff   :  { %471 = vsyncadd [#allocation6], 4294967040 }
 0x200   :  { %313 = vsyncpa [#allocation5], 1 }
 0x201   :  { %314 = vsyncpa [#allocation8], 1 }
 0x202   :  { %315 = vsyncpa [#allocation6], 1 }

</bundles_post_ra>
